<compile_context>
chip_gen: v7x
topology: tpu7x:2x2x1
jax: 0.10.0
libtpu: 0.0.40
codegen_flags: <defaults>
</compile_context>

<pallas_src>
import math
from functools import partial

import jax
import jax.numpy as jnp
from jax.experimental import pallas as pl
from jax.experimental.pallas import tpu as pltpu


def _round_up(v, m):
    return -(-v // m) * m


def _sublane(itemsize):
    # sublane packing granularity: f32 -> 8, bf16 -> 16, int8 -> 32
    return max(8, 32 // max(1, itemsize))


def _vmem_budget_bytes():
    """VMEM budget with headroom (v7x ~40 MiB, v5e/v6e ~100 MiB)."""
    cap = 64 * 1024 * 1024
    try:
        cap = int(pltpu.get_tpu_info().vmem_capacity_bytes)
    except Exception:
        pass
    return min(100 * 1024 * 1024, max(24 * 1024 * 1024, cap - 24 * 1024 * 1024))


def _target_block_bytes(budget):
    # ~2.5 MiB blocks on v7x (64 MiB VMEM), ~6 MiB on v5e/v6e (128 MiB VMEM).
    return 6 * 1024 * 1024 if budget > 64 * 1024 * 1024 else (5 * 1024 * 1024) // 2


def _largest_divisor_le(n, cap):
    cap = max(1, min(n, cap))
    for d in range(cap, 0, -1):
        if n % d == 0:
            return d
    return 1


# --------------------------------------------------------------------------- #
# Fused single-pass kernel: pool + center-tap conv + sigmoid + scale.
# --------------------------------------------------------------------------- #
def _eca_fused_kernel(x_ref, wt_ref, o_ref):
    # x_ref : (bt, C, HW)   input batch-slab (original dtype)
    # wt_ref: (C, C)        center-tap Conv1d weight, pre-transposed, 1/(H*W) folded
    # o_ref : (bt, C, HW)
    x = x_ref[...]
    pooled = jnp.sum(x, axis=-1, dtype=jnp.float32)                       # (bt, C)
    z = jnp.dot(pooled, wt_ref[...], preferred_element_type=jnp.float32)  # (bt, C)
    s = jax.nn.sigmoid(z).astype(x.dtype)                                 # (bt, C)
    o_ref[...] = x * s[:, :, None]


# --------------------------------------------------------------------------- #
# Two-pass fallback kernels.
# --------------------------------------------------------------------------- #
def _eca_pool_kernel(x_ref, sum_ref, acc_ref, *, hw_total, thw, nhw):
    # x_ref  : (bt, C, thw) input tile (original dtype)
    # sum_ref: (bt, C, 1)   spatial SUM output (f32)
    # acc_ref: (bt, C) f32  running spatial sum (scratch)
    hw_i = pl.program_id(1)

    @pl.when(hw_i == 0)
    def _init():
        acc_ref[...] = jnp.zeros_like(acc_ref)

    x = x_ref[...]
    if hw_total % thw != 0:
        # Ragged last spatial tile: mask out-of-bounds lanes before reducing
        # (the input block past HW holds garbage; never let it reach the sum).
        @pl.when(hw_i == nhw - 1)
        def _ragged():
            lane = jax.lax.broadcasted_iota(jnp.int32, x.shape, x.ndim - 1)
            valid = hw_total - hw_i * thw
            xm = jnp.where(lane < valid, x, jnp.zeros_like(x))
            acc_ref[...] += jnp.sum(xm, axis=-1, dtype=jnp.float32)

        @pl.when(hw_i != nhw - 1)
        def _full():
            acc_ref[...] += jnp.sum(x, axis=-1, dtype=jnp.float32)
    else:
        acc_ref[...] += jnp.sum(x, axis=-1, dtype=jnp.float32)

    @pl.when(hw_i == nhw - 1)
    def _finish():
        sum_ref[...] = acc_ref[...][:, :, None]


def _eca_scale_kernel(x_ref, s_ref, o_ref):
    # out = x * s, broadcasting (bt, C, 1) over the lane (spatial) axis.
    # s arrives already in x.dtype; partial output blocks are write-masked,
    # so no in-kernel masking is needed here.
    o_ref[...] = x_ref[...] * s_ref[...]


# --------------------------------------------------------------------------- #
# Host wrapper.
# --------------------------------------------------------------------------- #
def eca_forward(x, conv_weight, *, force_two_pass=False, spatial_tile=None):
    """x: (B, C, H, W); conv_weight: (C, C, k) Conv1d weight (bias=False)."""
    B, C, H, W = x.shape
    k = conv_weight.shape[-1]
    center = (k - 1) // 2
    HW = H * W
    itemsize = jnp.dtype(x.dtype).itemsize

    # Conv1d(C, C, k, pad=(k-1)//2) on a length-1 signal keeps only the center
    # tap -> (C, C) matmul.  Pre-transpose and fold in the 1/(H*W) mean so the
    # kernels only ever need spatial SUMS.
    wt = (conv_weight[:, :, center].T / float(HW)).astype(jnp.float32)  # (C, C)

    budget = _vmem_budget_bytes()
    x_flat = x.reshape(B, C, HW)  # contiguous reshape -> free

    # ---------------- fused single-pass path (x read once, out written once) --
    sub = _sublane(itemsize)
    blk_row = _round_up(C, sub) * _round_up(HW, 128) * itemsize  # one padded batch row
    w_bytes = _round_up(C, 8) * _round_up(C, 128) * 4
    bt_cap = B if B < 2 else max(1, B // 2)  # keep >= 2 batch steps (v7x: 2 TCs)

    bt_fused = None
    if not force_two_pass:
        for d in range(min(B, bt_cap), 0, -1):
            if B % d:
                continue
            # double-buffered in + double-buffered out + weight + slack
            if 4 * d * blk_row + 2 * w_bytes + (1 << 20) <= budget:
                bt_fused = d
                break

    if bt_fused is not None:
        nb = B // bt_fused
        out = pl.pallas_call(
            _eca_fused_kernel,
            out_shape=jax.ShapeDtypeStruct((B, C, HW), x.dtype),
            grid_spec=pltpu.PrefetchScalarGridSpec(
                num_scalar_prefetch=0,
                grid=(nb,),
                in_specs=[
                    pl.BlockSpec((bt_fused, C, HW), lambda b: (b, 0, 0)),
                    pl.BlockSpec((C, C), lambda b: (0, 0)),
                ],
                out_specs=pl.BlockSpec((bt_fused, C, HW), lambda b: (b, 0, 0)),
            ),
            compiler_params=pltpu.CompilerParams(
                dimension_semantics=("parallel",),
                vmem_limit_bytes=budget,
            ),
            cost_estimate=pl.CostEstimate(
                flops=int(2 * B * C * HW + 2 * B * C * C),
                transcendentals=int(B * C),
                bytes_accessed=int(2 * B * C * HW * itemsize + C * C * 4),
            ),
        )(x_flat, wt)
        return out.reshape(B, C, H, W)

    # ---------------- two-pass fallback ---------------------------------------
    target = _target_block_bytes(budget)

    if spatial_tile is not None:
        thw = min(_round_up(spatial_tile, 128), _round_up(HW, 128))
    else:
        thw_cap = max(128, (target // max(1, C * itemsize)) // 128 * 128)
        thw = min(_round_up(HW, 128), thw_cap)
    if thw >= HW:
        thw = HW  # full-extent lane dim: single spatial tile, no masking needed
    nhw = pl.cdiv(HW, thw)

    bt_cap2 = max(1, target // max(1, C * thw * itemsize))
    if B >= 2:
        bt_cap2 = min(bt_cap2, max(1, B // 2))  # >= 2 batch steps for v7x
    bt = _largest_divisor_le(B, bt_cap2)
    nb = B // bt

    # pass 1: spatial SUM pool (f32), ragged last tile masked in-kernel
    sums = pl.pallas_call(
        partial(_eca_pool_kernel, hw_total=HW, thw=thw, nhw=nhw),
        out_shape=jax.ShapeDtypeStruct((B, C, 1), jnp.float32),
        grid_spec=pltpu.PrefetchScalarGridSpec(
            num_scalar_prefetch=0,
            grid=(nb, nhw),
            in_specs=[pl.BlockSpec((bt, C, thw), lambda b, h: (b, 0, h))],
            out_specs=pl.BlockSpec((bt, C, 1), lambda b, h: (b, 0, 0)),
            scratch_shapes=[pltpu.VMEM((bt, C), jnp.float32)],
        ),
        compiler_params=pltpu.CompilerParams(
            dimension_semantics=("parallel", "arbitrary"),
            vmem_limit_bytes=budget,
        ),
        cost_estimate=pl.CostEstimate(
            flops=int(B * C * HW),
            transcendentals=0,
            bytes_accessed=int(B * C * HW * itemsize + B * C * 4),
        ),
    )(x_flat)

    # tiny (B, C) matmul + sigmoid in plain XLA: keeps the (C, C) f32 weight
    # out of VMEM entirely (negligible FLOPs, negligible bytes).
    s = jax.nn.sigmoid(jnp.dot(sums[:, :, 0], wt)).astype(x.dtype)[:, :, None]

    # pass 2: out = x * s (tiled elementwise, fully parallel, no masking)
    out = pl.pallas_call(
        _eca_scale_kernel,
        out_shape=jax.ShapeDtypeStruct((B, C, HW), x.dtype),
        grid_spec=pltpu.PrefetchScalarGridSpec(
            num_scalar_prefetch=0,
            grid=(nb, nhw),
            in_specs=[
                pl.BlockSpec((bt, C, thw), lambda b, h: (b, 0, h)),
                pl.BlockSpec((bt, C, 1), lambda b, h: (b, 0, 0)),
            ],
            out_specs=pl.BlockSpec((bt, C, thw), lambda b, h: (b, 0, h)),
        ),
        compiler_params=pltpu.CompilerParams(
            dimension_semantics=("parallel", "parallel"),
            vmem_limit_bytes=budget,
        ),
        cost_estimate=pl.CostEstimate(
            flops=int(B * C * HW),
            transcendentals=0,
            bytes_accessed=int(2 * B * C * HW * itemsize + B * C * itemsize),
        ),
    )(x_flat, s)

    return out.reshape(B, C, H, W)


def eca_kernel_size(c1, gamma=2, b=1):
    # Matches: int(abs((log2(c1) + b) / gamma)); bump to next odd if even.
    ks = int(abs((math.log2(c1) + b) / gamma))
    return ks if ks % 2 else ks + 1


def eca_reference(x, conv_weight):
    """Pure-JAX reference of the PyTorch forward (for sanity checking)."""
    k = conv_weight.shape[-1]
    center = (k - 1) // 2
    pooled = jnp.mean(x, axis=(2, 3))                # (B, C)
    z = pooled @ conv_weight[:, :, center].T         # (B, C)
    s = jax.nn.sigmoid(z)
    return x * s[:, :, None, None]


if __name__ == "__main__":
    key = jax.random.PRNGKey(0)
    kx, kw, kx2 = jax.random.split(key, 3)

    # --- test 1: fused single-pass path -------------------------------------
    B, C, H, W = 2, 4, 16, 16
    k = eca_kernel_size(C)
    bound = 1.0 / math.sqrt(C * k)
    x = jax.random.normal(kx, (B, C, H, W), dtype=jnp.float32)
    conv_weight = jax.random.uniform(
        kw, (C, C, k), dtype=jnp.float32, minval=-bound, maxval=bound)

    out = jax.block_until_ready(eca_forward(x, conv_weight))
    ref = eca_reference(x, conv_weight)
    assert out.shape == (B, C, H, W)
    assert jnp.allclose(out, ref, atol=1e-5, rtol=1e-5)

    # --- test 2: two-pass fallback with a ragged (non-128-multiple) spatial ---
    # tile so the in-kernel masking path is exercised.
    B2, C2, H2, W2 = 2, 4, 15, 15
    x2 = jax.random.normal(kx2, (B2, C2, H2, W2), dtype=jnp.float32)
    out2 = jax.block_until_ready(
        eca_forward(x2, conv_weight, force_two_pass=True, spatial_tile=128))
    ref2 = eca_reference(x2, conv_weight)
    assert out2.shape == (B2, C2, H2, W2)
    assert jnp.allclose(out2, ref2, atol=1e-5, rtol=1e-5)

    print("KERNEL_OK")
</pallas_src>

<mosaic_0001>
module attributes {stable_mosaic.version = 11 : i64} {
  func.func @_eca_fused_kernel(%arg0: i32, %arg1: memref<1x4x256xf32, #tpu.memory_space<vmem>>, %arg2: memref<4x4xf32, #tpu.memory_space<vmem>>, %arg3: memref<1x4x256xf32, #tpu.memory_space<vmem>>) attributes {dimension_semantics = [#tpu.dimension_semantics<parallel>], iteration_bounds = array<i64: 2>, scalar_prefetch = 0 : i64, scratch_operands = 0 : i64, tpu.core_type = #tpu.core_type<tc>, window_params = [{transform_indices = @transform_0, window_bounds = array<i64: 1, 4, 256>}, {pipeline_mode = #tpu.pipeline_mode<synchronous>, transform_indices = @transform_1, window_bounds = array<i64: 4, 4>}, {transform_indices = @transform_2, window_bounds = array<i64: 1, 4, 256>}]} {
    %c0 = arith.constant 0 : index
    %c0_0 = arith.constant 0 : index
    %c0_1 = arith.constant 0 : index
    %0 = vector.load %arg1[%c0, %c0_0, %c0_1] : memref<1x4x256xf32, #tpu.memory_space<vmem>>, vector<1x4x256xf32>
    %cst = arith.constant dense<0.000000e+00> : vector<1x4xf32>
    %1 = vector.multi_reduction <add>, %0, %cst [2] : vector<1x4x256xf32> to vector<1x4xf32>
    %c0_2 = arith.constant 0 : index
    %c0_3 = arith.constant 0 : index
    %2 = vector.load %arg2[%c0_2, %c0_3] : memref<4x4xf32, #tpu.memory_space<vmem>>, vector<4x4xf32>
    %cst_4 = arith.constant dense<0.000000e+00> : vector<1x4xf32>
    %3 = tpu.matmul %1, %2, %cst_4 {dimension_numbers = #tpu.dot_dimension_numbers<[1], [0], [0], [1], [0, 0, 1, 1], [], []>} : vector<1x4xf32>, vector<4x4xf32>, vector<1x4xf32> -> vector<1x4xf32>
    %4 = arith.negf %3 : vector<1x4xf32>
    %5 = math.exp %4 : vector<1x4xf32>
    %cst_5 = arith.constant 1.000000e+00 : f32
    %6 = vector.broadcast %cst_5 : f32 to vector<1x4xf32>
    %7 = arith.addf %6, %5 : vector<1x4xf32>
    %8 = arith.divf %6, %7 : vector<1x4xf32>
    %9 = vector.shape_cast %8 : vector<1x4xf32> to vector<1x4x1xf32>
    %10 = vector.broadcast %9 : vector<1x4x1xf32> to vector<1x4x256xf32>
    %11 = arith.mulf %0, %10 : vector<1x4x256xf32>
    %c0_6 = arith.constant 0 : index
    %c0_7 = arith.constant 0 : index
    %c0_8 = arith.constant 0 : index
    %12 = vector.load %arg3[%c0_6, %c0_7, %c0_8] : memref<1x4x256xf32, #tpu.memory_space<vmem>>, vector<1x4x256xf32>
    tpu.vector_store %arg3[%c0_6, %c0_7, %c0_8], %11 {strides = array<i32>} : memref<1x4x256xf32, #tpu.memory_space<vmem>>, vector<1x4x256xf32>,
    return
  }
  func.func @transform_0(%arg0: i32) -> (i32, i32, i32) {
    %c0_i32 = arith.constant 0 : i32
    %c0_i32_0 = arith.constant 0 : i32
    %c0_i32_1 = arith.constant 0 : i32
    return %arg0, %c0_i32, %c0_i32_0 : i32, i32, i32
  }
  func.func @transform_1(%arg0: i32) -> (i32, i32) {
    %c0_i32 = arith.constant 0 : i32
    %c0_i32_0 = arith.constant 0 : i32
    %c0_i32_1 = arith.constant 0 : i32
    return %c0_i32, %c0_i32_0 : i32, i32
  }
  func.func @transform_2(%arg0: i32) -> (i32, i32, i32) {
    %c0_i32 = arith.constant 0 : i32
    %c0_i32_0 = arith.constant 0 : i32
    %c0_i32_1 = arith.constant 0 : i32
    return %arg0, %c0_i32, %c0_i32_0 : i32, i32, i32
  }
}

</mosaic_0001>

<bundles_post_ra>
// kernel: tpu_custom_call.1
= control target key start
LH: loop header
LB: loop body
LE: loop exit
PB: predicated region body
PF: predicated region fallthrough
CT: control target
= control target key end

     0   :  { %7 = vsyncpa [#allocation3], 0  ;;  %s835_s0 = inlined_call_operand.hbm [shape: f32[2,4,256], index: 0, kind: input, shape index: {}]   ;;  %s836_s1 = inlined_call_operand.hbm [shape: f32[4,4], index: 1, kind: input, shape index: {}]   ;;  %s837_s2 = inlined_call_operand.hbm [shape: f32[2,4,256], index: 2, kind: output, shape index: {}]  }
   0x1   :  { %9 = vsyncpa [#allocation3 + $0x1], 0 }
   0x2   :  { %10 = vsyncpa [#allocation6], 0 }
   0x3   :  { %11 = vsyncpa [#allocation4], 0 }
   0x4   :  { %13 = vsyncpa [#allocation4 + $0x1], 0  ;;  %s630_s9 = smov 0   ;;  %s632_s10 = smov 0  }
   0x5   :  { %s634_s11 = smov 0   ;;  %s636_s12 = smov 0  }
   0x6 LB: > { %s651_s13 = sadd.s32 4294967295, %s607_s12   ;;  %s386_s14 = sadd.s32 4294967294, %s607_s12   ;;  %s607_s12 = sphi %s636_s12, %s861_s12   ;;  %s603_s11 = sphi %s634_s11, %s860_s11   ;;  %s599_s10 = sphi %s632_s10, %s859_s10   ;;  %s595_s9 = sphi %s630_s9, %s858_s9  }
   0x7   : > { %p39_p0 = scmp.ne.s32.totalorder %s599_s10, %s595_s9  ;;  %p838_p1 = scmp.eq.s32.totalorder %s651_s13, 0 }
   0x8   : > { %p90_p3 = scmp.eq.s32.totalorder %s386_s14, 1  ;;  %p387_p5 = scmp.ge.s32.totalorder %s607_s12, 1 }
   0x9   : > { %p660_p4 = por %p838_p1, %p39_p0  ;;  %p97_p7 = scmp.lt.s32.totalorder %s607_s12, 3 }
   0xa   : > { %p665_p6 = por %p90_p3, %p39_p0  ;;  %s609_s18 = smov [#allocation5]  }
   0xb   : > { %s841_s15 = scalar_select %p660_p4, 1, 0 }
   0xc   : > { %s842_s16 = scalar_select %p665_p6, 1, 0 }
   0xd   : > { %p670_p8 = pnand %p387_p5, %p97_p7  ;;  %s110_s19 = sshll.u32 %s609_s18, 4  ;;  %s111_s19 = int_to_ptr.vmem [resolvable:$true] %s110_s19 }
   0xe   : > { %s678_s20 = sadd.s32 1, %s607_s12   ;;  %s26_s24 = sadd.s32 1, %s603_s11 }
   0xf   : > { %s843_s17 = scalar_select %p670_p8, 1, 0 }
  0x10   : > { %p422_p10 = pneg %p670_p8  ;;  %s23_s22 = ssub.s32 %s607_s12, %s678_s20 }
  0x11   : > { %p688_p12 = scmp.eq.s32.totalorder %s23_s22, 0  ;;  %s479_s27 = scalar_lea.hbm %s836_s1, 64 }
  0x12   : > { %p682_p11 = pnand %p422_p10, %p838_p1  ;;  %p480_p0 = scmp.ne.s32.totalorder %s836_s1, %s479_s27 }
  0x13   : > { %s845_s23 = scalar_select %p688_p12, 1, 0 }
  0x14   : > { %p481_p3 = pneg %p682_p11  ;;  %p486_p10 = scmp.lt.u32.totalorder %s479_s27, %s836_s1 }
  0x16   : > { %p482_p5 = pnand %p481_p3, %p480_p0 }
  0x18   : > { %p483_p7 = pneg %p482_p5 }
  0x1a   : > { %p488_p9 = pnand %p486_p10, %p483_p7 }
  0x1c   : > { %491 = shalt.err (!%p488_p9)
}
  0x1d   : > { %s492_s4 = scalar_lea.vmem %s111_s19, 64  ;;  %p500_p6 = scmp.lt.s32.totalorder %s111_s19, %s111_s19 }
  0x1e   : > { %p493_p1 = scmp.ne.s32.totalorder %s111_s19, %s492_s4  ;;  %p501_p4 = scmp.lt.s32.totalorder %s492_s4, %s492_s4 }
  0x20   : > { %p495_p2 = pnand %p493_p1, %p481_p3  ;;  %p502_p8 = por %p501_p4, %p500_p6 }
  0x22   : > { %p496_p13 = pneg %p495_p2 }
  0x24   : > { %p503_p12 = pnand %p502_p8, %p496_p13 }
  0x26   : > { %506 = shalt.err (!%p503_p12)
}
  0x27   : > { %425 = dma.hbm_to_vmem [thread:$0]  (!%p682_p11), %s836_s1, 64, %s111_s19, [#allocation6]  }
  0x28   : > { %p846_p1 = scmp.ne.s32.totalorder %s845_s23, 0  ;;  %p34_p2 = scmp.eq.s32.totalorder %s607_s12, 0 }
  0x29   : > { %p847_p4 = scmp.ne.s32.totalorder %s603_s11, %s599_s10  ;;  %p848_p6 = scmp.eq.s32.totalorder %s651_s13, 1 }
  0x2a   : > { %s714_s7 = scalar_select %p846_p1, %s603_s11, %s26_s24  }
  0x2b   : > { %p722_p8 = por %p848_p6, %p847_p4  ;;  %p435_p9 = scmp.lt.s32.totalorder %s607_s12, 2 }
  0x2c   : > { %s121_s14 = sand.u32 1, %s603_s11   ;;  %p850_p12 = pmov %p847_p4 }
  0x2d   : > { %s390_s18 = sshll.u32 %s121_s14, 3  ;;  %s405_s21 = sshll.u32 %s607_s12, 7 }
  0x2e   : > { %p35_p13 = por %p34_p2, %p850_p12  ;;  %s735_s19 = scalar_lea.hbm %s835_s0, %s405_s21 }
  0x2f   : > { %s125_s23 = scalar_lea.vmem [#allocation2], %s390_s18  ;;  %s122_s27 = scalar_lea.sflag [#allocation3], %s121_s14 }
  0x30   : > { %s133_s24 = sshll.u32 %s125_s23, 4  ;;  %p737_p11 = pnand %p435_p9, %p35_p13  ;;  %s741_s24 = int_to_ptr.vmem [resolvable:$true] %s133_s24 }
  0x31   : > { %s507_s28 = scalar_lea.hbm %s735_s19, 128  ;;  %s512_s3 = scalar_lea.hbm %s835_s0, 256 }
  0x32   : > { %p508_p0 = scmp.ne.s32.totalorder %s735_s19, %s507_s28  ;;  %p509_p3 = pneg %p737_p11 }
  0x33   : > { %p513_p10 = scmp.lt.u32.totalorder %s735_s19, %s835_s0  ;;  %p514_p1 = scmp.lt.u32.totalorder %s512_s3, %s507_s28 }
  0x34   : > { %p510_p5 = pnand %p509_p3, %p508_p0  ;;  %p516_p4 = scmp.lt.u32.totalorder %s507_s28, %s735_s19 }
  0x35   : > { %p515_p2 = por %p514_p1, %p513_p10 }
  0x36   : > { %p511_p7 = pneg %p510_p5 }
  0x37   : > { %p517_p6 = por %p516_p4, %p515_p2 }
  0x39   : > { %p518_p9 = pnand %p517_p6, %p511_p7 }
  0x3b   : > { %521 = shalt.err (!%p518_p9)
}
  0x3c   : > { %s522_s6 = scalar_lea.vmem %s741_s24, 128  ;;  %s610_s14 = smov [#allocation2]  }
  0x3d   : > { %p523_p12 = scmp.ne.s32.totalorder %s741_s24, %s522_s6  ;;  %s527_s18 = sshll.u32 %s610_s14, 4  ;;  %s528_s18 = int_to_ptr.vmem [resolvable:$false] %s527_s18 }
  0x3e   : > { %s529_s21 = scalar_lea.vmem %s528_s18, 256  ;;  %p530_p5 = scmp.lt.s32.totalorder %s741_s24, %s528_s18 }
  0x3f   : > { %p525_p13 = pnand %p523_p12, %p509_p3  ;;  %p531_p10 = scmp.lt.s32.totalorder %s529_s21, %s522_s6 }
  0x41   : > { %p526_p0 = pneg %p525_p13  ;;  %p532_p1 = por %p531_p10, %p530_p5 }
  0x43   : > { %p533_p2 = pnand %p532_p1, %p526_p0 }
  0x45   : > { %536 = shalt.err (!%p533_p2)
}
  0x46   : > { %429 = dma.hbm_to_vmem [thread:$0]  (!%p737_p11), %s735_s19, 128, %s741_s24, %s122_s27  }
  0x47   : > { %p852_p7 = scmp.ne.s32.totalorder %s843_s17, 0 }
  0x48   : > { %s771_s22 = sand.u32 (!%p852_p7), 1, %s599_s10   ;;  %p853_p3 = scmp.ne.s32.totalorder (!%p852_p7), %s841_s15, 0 }
  0x49   : > { %142 = sbr.rel (%p852_p7) target bundleno = 607 (0x25f), region = 28  ;;  %s394_s25 = sshll.u32 (!%p852_p7), %s771_s22, 3 }
  0x4a   : > { %s145_s23 = scalar_lea.sflag (!%p852_p7), [#allocation3], %s771_s22  ;;  %s148_s28 = scalar_lea.vmem (!%p852_p7), [#allocation2], %s394_s25 }
  0x50   : > { %582 = dma.done.wait (%p853_p3), %s145_s23, 128  }
  0x51   : > { %584 = vsyncadd (%p853_p3), %s145_s23, 4294967168  ;;  %p854_p11 = scmp.eq.s32.totalorder %s651_s13, 0 }
  0x53   : > { %586 = dma.done.wait (%p854_p11), [#allocation6], 64   ;;  %p855_p4 = pmov %p854_p11 }
  0x54   : > { %vm177_vm0 = vcmask 1043456   ;;  %v173_v0 = vld [vmem:[%s148_s28] sm:$0xff]  ;;  %v611_v5 = vmov 0.0   ;;  %v183_v6 = vld [vmem:[#allocation5] sm:$0xf]  ;;  %vm612_vm1 = vmmov 0   ;;  %v185_v7 = vlaneseq }
  0x55   : > { %588 = vsyncadd (%p855_p4), [#allocation6], 4294967232  ;;  %v175_v1 = vcombine.high %v173_v0, %v173_v0  ;;  %v178_v2 = vsel %vm177_vm0, %v173_v0, 0.0  ;;  %409 = vmatprep.subr.mxu0 %v611_v5  ;;  %411 = vmatprep.mubr.msk.f32.mxu0 %vm612_vm1, %v611_v5  ;;  %vm191_vm2 = vcmask 31744   ;;  %v613_v21 = vmov 839922192  }
  0x56   : > { %410 = vmatpush3.msk.msra.mxu0 %vm177_vm0, %v183_v6  ;;  %v186_v8 = vand.u32 127, %v185_v7  ;;  %v188_v9 = vshrl.u32 %v185_v7, 7  ;;  %v282_v22 = vunpack.c.l.s4 %v613_v21  ;;  %s406_s15 = sshll.u32 %s651_s13, 7  ;;  %s172_s17 = scalar_lea.vmem [#allocation7], %s394_s25 }
  0x57   : > { %v179_v3 = vsel %vm177_vm0, %v175_v1, 0.0  ;;  %s306_s19 = sshll.u32 %s172_s17, 4  ;;  %s791_s27 = scalar_lea.hbm %s837_s2, %s406_s15  ;;  %s793_s19 = int_to_ptr.vmem [resolvable:$true] %s306_s19 }
  0x58   : > { %v180_v4 = vadd.f32 %v179_v3, %v178_v2  ;;  %v189_v10 = vsub.s32 %v186_v8, %v188_v9  ;;  %v275_v18 = vsub.s32 0, %v188_v9  ;;  %v283_v23 = vunpack.c.0.s8 %v282_v22  ;;  %s292_s29 = scalar_lea.sflag [#allocation4], %s771_s22  ;;  %s537_s30 = scalar_lea.vmem %s793_s19, 128 }
  0x59   : > { %p538_p6 = scmp.ne.s32.totalorder %s793_s19, %s537_s30  ;;  %s614_s13 = smov [#allocation7]  }
  0x5a   : > { %181 = vadd.xlane.f32.xlu0 %v180_v4  ;;  %v286_v24 = vsub.s32 %v283_v23, %v188_v9  ;;  %s541_s3 = sshll.u32 %s614_s13, 4  ;;  %s542_s3 = int_to_ptr.vmem [resolvable:$false] %s541_s3 }
  0x5b   : > { %p539_p9 = pnand %p538_p6, %p722_p8  ;;  %s543_s4 = scalar_lea.vmem %s542_s3, 256 }
  0x5c   : > { %p544_p13 = scmp.lt.s32.totalorder %s793_s19, %s542_s3  ;;  %p545_p0 = scmp.lt.s32.totalorder %s543_s4, %s537_s30 }
  0x5d   : > { %p540_p12 = pneg %p539_p9 }
  0x5e   : > { %p546_p5 = por %p545_p0, %p544_p13 }
  0x60   : > { %p547_p10 = pnand %p546_p5, %p540_p12 }
  0xe7   : > { %v182_v11 = vpop.xlane.xlu0 %181 }
  0xe8   : > { %v190_v12 = vrot.slane %v182_v11, %v189_v10 }
  0xea   : > { %412 = vmatmul.mubr.msk.f32.vlgmr.msra.gmra.mrb[0].mxu0 %vm191_vm2, %v190_v12 }
 0x1bd   : > { %v263_v13 = vpop.f32.mrb[0].mxu0 }
 0x1be   : > { %v399_v14 = vmul.f32 -1.442695, %v263_v13  ;;  %v413_v15 = vpop.f32.mrb[1].mxu0 }
 0x1c0   : > { %475 = vpow2.f32 %v399_v14 }
 0x1ca   : > { %v476_v16 = vpop.eup %475 }
 0x1cb   : > { %v270_v17 = vadd.f32 1.0, %v476_v16 }
 0x1cd   : > { %477 = vrcp.f32 %v270_v17 }
 0x1d7   : > { %v478_v19 = vpop.eup %477 }
 0x1d8   : > { %v276_v20 = vrot.slane %v478_v19, %v275_v18 }
 0x1da   : > { %278 = vbcast.lane.b32.xlu0 %v276_v20, 256 }
 0x24c   : > { %v279_v25 = vpop.permute.xlu0 %278 }
 0x24d   : > { %v287_v26 = vrot.slane %v279_v25, %v286_v24 }
 0x24f   : > { %v289_v27 = vmul.f32 %v287_v26, %v173_v0 }
 0x251   : > { %290 = vst [vmem:[%s172_s17] sm:$0xff] %v289_v27 }
 0x252   : > { %550 = shalt.err (!%p547_p10)
}
 0x253   : > { %s551_s5 = scalar_lea.hbm %s791_s27, 128  ;;  %s555_s18 = scalar_lea.hbm %s837_s2, 256 }
 0x254   : > { %p552_p1 = scmp.ne.s32.totalorder %s791_s27, %s551_s5  ;;  %p556_p3 = scmp.lt.u32.totalorder %s791_s27, %s837_s2 }
 0x255   : > { %p557_p11 = scmp.lt.u32.totalorder %s555_s18, %s551_s5  ;;  %p559_p6 = scmp.lt.u32.totalorder %s551_s5, %s791_s27 }
 0x256   : > { %p553_p2 = pnand %p552_p1, %p722_p8 }
 0x257   : > { %p558_p4 = por %p557_p11, %p556_p3 }
 0x258   : > { %p554_p7 = pneg %p553_p2 }
 0x259   : > { %p560_p9 = por %p559_p6, %p558_p4 }
 0x25b   : > { %p561_p12 = pnand %p560_p9, %p554_p7 }
 0x25d   : > { %564 = shalt.err (!%p561_p12)
}
 0x25e   : > { %420 = dma.vmem_to_hbm [thread:$0]  (%p722_p8), %s793_s19, 128, %s791_s27, %s292_s29  }
 0x25f PF: > { %s318_s25 = sand.u32 1, %s595_s9   ;;  %p856_p13 = scmp.ne.s32.totalorder %s842_s16, 0 }
 0x260   : > { %p857_p0 = scmp.ge.s32.totalorder %s607_s12, 2  ;;  %s319_s23 = scalar_lea.sflag [#allocation4], %s318_s25 }
 0x262   : > { %p431_p5 = pnand %p857_p0, %p856_p13 }
 0x264   : > { %590 = dma.done.wait (!%p431_p5), %s319_s23, 128  }
 0x265   : > { %592 = vsyncadd (!%p431_p5), %s319_s23, 4294967168  ;;  %p16_p10 = scmp.ge.s32.totalorder %s678_s20, 4   ;;  %s858_s9 = smov %s599_s10 }
 0x266   : > { %s859_s10 = smov %s603_s11  ;;  %s860_s11 = smov %s714_s7 }
 0x267   : > { %s861_s12 = smov %s678_s20  ;;  %18 = sbr.rel (!%p16_p10) target bundleno = 6 (0x6), region = 77 }
 0x26e   :  { %324 = vsyncpa [#allocation3], 1 }
 0x26f   :  { %326 = vsyncpa [#allocation3 + $0x1], 1 }
 0x270   :  { %327 = vsyncpa [#allocation6], 1 }
 0x271   :  { %328 = vsyncpa [#allocation4], 1 }
 0x272   :  { %330 = vsyncpa [#allocation4 + $0x1], 1 }

</bundles_post_ra>
